<compile_context>
chip_gen: v5e
topology: v5e:2x2
jax: 0.10.0
libtpu: 0.0.40
codegen_flags: <defaults>
</compile_context>

<pallas_src>
import math

import jax
import jax.numpy as jnp
from jax.experimental import pallas as pl
from jax.experimental.pallas import tpu as pltpu


def _round_up(x, m):
    return (x + m - 1) // m * m


def aplinear_kernel(x_ref, wq_ref, scale_ref, o_ref, acc_ref):
    # x_ref:     (tm, tk)  activations (bf16/f32)
    # wq_ref:    (tk, tn)  int8 pre-binarized, pre-transposed weight in {-1, 0, +1}
    # scale_ref: (1, tn)   per-output-channel scale
    # o_ref:     (tm, tn)  output
    # acc_ref:   (tm, tn)  f32 scratch accumulator
    k = pl.program_id(2)

    @pl.when(k == 0)
    def _init():
        acc_ref[...] = jnp.zeros_like(acc_ref)

    # int8 {-1, 0, +1} -> activation dtype (one cheap VPU cast per element);
    # (K, N) layout is MXU-native, so this is a plain K-contraction (no transpose).
    w = wq_ref[...].astype(jnp.float32).astype(x_ref.dtype)
    acc_ref[...] += jnp.dot(x_ref[...], w, preferred_element_type=jnp.float32)

    @pl.when(k == pl.num_programs(2) - 1)
    def _finalize():
        scale = scale_ref[...].astype(jnp.float32)          # (1, tn), broadcast over rows
        o_ref[...] = (acc_ref[...] * scale).astype(o_ref.dtype)


def aplinear_forward(x, weight, scale, *, tm_max=1024, tn_max=1024, tk_max=1024,
                     vmem_limit_bytes=48 * 1024 * 1024):
    """x: (..., in_features); weight: (out, in); scale: (out,)."""
    *lead, k = x.shape
    n, kw = weight.shape
    assert kw == k, "weight / activation in_features mismatch"
    m = 1
    for d in lead:
        m *= d
    x2d = x.reshape(m, k)

    # --- one-time, weight-stationary prep (outside the kernel) -----------------
    # torch.sign semantics (sign(0) == 0); int8 halves the weight HBM stream;
    # transpose to (K, N) so the MXU gets its native layout.
    wq_t = jnp.sign(weight).astype(jnp.int8).T               # (K, N) in {-1, 0, +1}
    scale2d = scale.reshape(1, n)

    # --- tile selection ---------------------------------------------------------
    # tm multiple of 16 (bf16 sublane packing); tn/tk multiples of 128 (lane/MXU);
    # large tk amortizes the f32 accumulator read-modify-write per unit of MXU work.
    mp_full = _round_up(m, 16)
    np_full = _round_up(n, 128)
    kp_full = _round_up(k, 128)
    tm = min(tm_max, mp_full)
    tn = min(tn_max, np_full)
    tk = min(tk_max, kp_full)
    # Keep v7x's two TensorCores busy: if the problem fits a single "parallel"
    # (i, j) block but N is splittable, split N in half (grid_m * grid_n >= 2).
    if tm >= mp_full and tn >= np_full and np_full >= 256:
        tn = ((np_full // 128 + 1) // 2) * 128

    mp = _round_up(m, tm)
    np_ = _round_up(n, tn)
    kp = _round_up(k, tk)

    # Zero padding is exact: padded K columns contribute 0, padded M rows / N
    # columns are sliced off below.
    if (mp, kp) != (m, k):
        x2d = jnp.pad(x2d, ((0, mp - m), (0, kp - k)))
    if (kp, np_) != (k, n):
        wq_t = jnp.pad(wq_t, ((0, kp - k), (0, np_ - n)))
    if np_ != n:
        scale2d = jnp.pad(scale2d, ((0, 0), (0, np_ - n)))

    grid_m, grid_n, grid_k = mp // tm, np_ // tn, kp // tk

    out = pl.pallas_call(
        aplinear_kernel,
        out_shape=jax.ShapeDtypeStruct((mp, np_), x.dtype),
        grid_spec=pltpu.PrefetchScalarGridSpec(
            num_scalar_prefetch=0,
            grid=(grid_m, grid_n, grid_k),
            in_specs=[
                pl.BlockSpec((tm, tk), lambda i, j, kk: (i, kk)),   # activations
                pl.BlockSpec((tk, tn), lambda i, j, kk: (kk, j)),   # int8 binarized W^T
                pl.BlockSpec((1, tn), lambda i, j, kk: (0, j)),     # per-channel scale
            ],
            out_specs=pl.BlockSpec((tm, tn), lambda i, j, kk: (i, j)),
            scratch_shapes=[pltpu.VMEM((tm, tn), jnp.float32)],
        ),
        compiler_params=pltpu.CompilerParams(
            dimension_semantics=("parallel", "parallel", "arbitrary"),
            vmem_limit_bytes=vmem_limit_bytes,
        ),
        cost_estimate=pl.CostEstimate(
            flops=2 * m * n * k,
            transcendentals=0,
            # realistic HBM picture: x re-streamed grid_n times, W grid_m times,
            # int8 weight bytes, plus the output writeback.
            bytes_accessed=(grid_n * mp * kp * x2d.dtype.itemsize
                            + grid_m * kp * np_ * 1
                            + mp * np_ * x.dtype.itemsize),
        ),
    )(x2d, wq_t, scale2d)

    return out[:m, :n].reshape(*lead, n)


def init_aplinear_params(key, in_features, out_features, is_A=False,
                         dtype=jnp.bfloat16):
    # Mirrors APLinear.__init__
    w = jax.random.normal(key, (out_features, in_features), dtype=jnp.float32)
    if is_A:
        w = w * math.sqrt(2.0 / in_features)
    else:
        w = w * 0.01
    w = w.astype(dtype)
    scale = (jnp.abs(w).astype(jnp.float32).mean(axis=1) + 1e-6).astype(dtype)
    return w, scale


if __name__ == "__main__":
    in_features = 32
    out_features = 64
    batch, seq = 2, 8

    key = jax.random.PRNGKey(0)
    kx, kw = jax.random.split(key)

    weight, scale = init_aplinear_params(kw, in_features, out_features, is_A=True)
    x = jax.random.normal(kx, (batch, seq, in_features), dtype=jnp.float32).astype(
        jnp.bfloat16
    )

    out = aplinear_forward(x, weight, scale)
    out = jax.block_until_ready(out)

    # reference check in plain JAX (same quantization semantics, f32 math)
    qw_ref = (jnp.sign(weight) * scale[:, None]).astype(jnp.bfloat16)
    ref = jnp.einsum(
        "bsk,nk->bsn", x.astype(jnp.float32), qw_ref.astype(jnp.float32)
    ).astype(jnp.bfloat16)
    assert out.shape == (batch, seq, out_features)
    assert jnp.allclose(
        out.astype(jnp.float32), ref.astype(jnp.float32), atol=1e-2, rtol=2e-2
    )

    print("KERNEL_OK")
</pallas_src>

<mosaic_0001>
module attributes {stable_mosaic.version = 11 : i64} {
  func.func @aplinear_kernel(%arg0: i32, %arg1: i32, %arg2: i32, %arg3: memref<16x128xbf16, #tpu.memory_space<vmem>>, %arg4: memref<128x128xi8, #tpu.memory_space<vmem>>, %arg5: memref<1x128xbf16, #tpu.memory_space<vmem>>, %arg6: memref<16x128xbf16, #tpu.memory_space<vmem>>, %arg7: memref<16x128xf32, #tpu.memory_space<vmem>>) attributes {dimension_semantics = [#tpu.dimension_semantics<parallel>, #tpu.dimension_semantics<parallel>, #tpu.dimension_semantics<arbitrary>], iteration_bounds = array<i64: 1, 1, 1>, scalar_prefetch = 0 : i64, scratch_operands = 1 : i64, tpu.core_type = #tpu.core_type<tc>, window_params = [{transform_indices = @transform_0, window_bounds = array<i64: 16, 128>}, {transform_indices = @transform_1, window_bounds = array<i64: 128, 128>}, {transform_indices = @transform_2, window_bounds = array<i64: 1, 128>}, {transform_indices = @transform_3, window_bounds = array<i64: 16, 128>}]} {
    %c0_i32 = arith.constant 0 : i32
    %0 = arith.cmpi eq, %arg2, %c0_i32 : i32
    %1 = arith.extui %0 : i1 to i32
    %c0_i32_0 = arith.constant 0 : i32
    %2 = arith.cmpi ne, %1, %c0_i32_0 : i32
    scf.if %2 {
      %cst_10 = arith.constant 0.000000e+00 : f32
      %14 = vector.broadcast %cst_10 : f32 to vector<16x128xf32>
      %c0_11 = arith.constant 0 : index
      %c0_12 = arith.constant 0 : index
      %15 = vector.load %arg7[%c0_11, %c0_12] : memref<16x128xf32, #tpu.memory_space<vmem>>, vector<16x128xf32>
      tpu.vector_store %arg7[%c0_11, %c0_12], %14 {strides = array<i32>} : memref<16x128xf32, #tpu.memory_space<vmem>>, vector<16x128xf32>,
    } else {
    }
    %c0 = arith.constant 0 : index
    %c0_1 = arith.constant 0 : index
    %3 = vector.load %arg4[%c0, %c0_1] : memref<128x128xi8, #tpu.memory_space<vmem>>, vector<128x128xi8>
    %4 = arith.sitofp %3 : vector<128x128xi8> to vector<128x128xf32>
    %5 = arith.truncf %4 : vector<128x128xf32> to vector<128x128xbf16>
    %c0_2 = arith.constant 0 : index
    %c0_3 = arith.constant 0 : index
    %6 = vector.load %arg7[%c0_2, %c0_3] : memref<16x128xf32, #tpu.memory_space<vmem>>, vector<16x128xf32>
    %c0_4 = arith.constant 0 : index
    %c0_5 = arith.constant 0 : index
    %7 = vector.load %arg3[%c0_4, %c0_5] : memref<16x128xbf16, #tpu.memory_space<vmem>>, vector<16x128xbf16>
    %cst = arith.constant dense<0.000000e+00> : vector<16x128xf32>
    %8 = tpu.matmul %7, %5, %cst {dimension_numbers = #tpu.dot_dimension_numbers<[1], [0], [0], [1], [0, 0, 1, 1], [], []>} : vector<16x128xbf16>, vector<128x128xbf16>, vector<16x128xf32> -> vector<16x128xf32>
    %9 = arith.addf %6, %8 : vector<16x128xf32>
    %c0_6 = arith.constant 0 : index
    %c0_7 = arith.constant 0 : index
    %10 = vector.load %arg7[%c0_6, %c0_7] : memref<16x128xf32, #tpu.memory_space<vmem>>, vector<16x128xf32>
    tpu.vector_store %arg7[%c0_6, %c0_7], %9 {strides = array<i32>} : memref<16x128xf32, #tpu.memory_space<vmem>>, vector<16x128xf32>,
    %c0_i32_8 = arith.constant 0 : i32
    %11 = arith.cmpi eq, %arg2, %c0_i32_8 : i32
    %12 = arith.extui %11 : i1 to i32
    %c0_i32_9 = arith.constant 0 : i32
    %13 = arith.cmpi ne, %12, %c0_i32_9 : i32
    scf.if %13 {
      %c0_10 = arith.constant 0 : index
      %c0_11 = arith.constant 0 : index
      %14 = vector.load %arg5[%c0_10, %c0_11] : memref<1x128xbf16, #tpu.memory_space<vmem>>, vector<1x128xbf16>
      %15 = arith.extf %14 : vector<1x128xbf16> to vector<1x128xf32>
      %c0_12 = arith.constant 0 : index
      %c0_13 = arith.constant 0 : index
      %16 = vector.load %arg7[%c0_12, %c0_13] : memref<16x128xf32, #tpu.memory_space<vmem>>, vector<16x128xf32>
      %17 = vector.broadcast %15 : vector<1x128xf32> to vector<16x128xf32>
      %18 = arith.mulf %16, %17 : vector<16x128xf32>
      %19 = arith.truncf %18 : vector<16x128xf32> to vector<16x128xbf16>
      %c0_14 = arith.constant 0 : index
      %c0_15 = arith.constant 0 : index
      %20 = vector.load %arg6[%c0_14, %c0_15] : memref<16x128xbf16, #tpu.memory_space<vmem>>, vector<16x128xbf16>
      tpu.vector_store %arg6[%c0_14, %c0_15], %19 {strides = array<i32>} : memref<16x128xbf16, #tpu.memory_space<vmem>>, vector<16x128xbf16>,
    } else {
    }
    return
  }
  func.func @transform_0(%arg0: i32, %arg1: i32, %arg2: i32) -> (i32, i32) {
    %c0_i32 = arith.constant 0 : i32
    return %arg0, %arg2 : i32, i32
  }
  func.func @transform_1(%arg0: i32, %arg1: i32, %arg2: i32) -> (i32, i32) {
    %c0_i32 = arith.constant 0 : i32
    return %arg2, %arg1 : i32, i32
  }
  func.func @transform_2(%arg0: i32, %arg1: i32, %arg2: i32) -> (i32, i32) {
    %c0_i32 = arith.constant 0 : i32
    %c0_i32_0 = arith.constant 0 : i32
    return %c0_i32, %arg1 : i32, i32
  }
  func.func @transform_3(%arg0: i32, %arg1: i32, %arg2: i32) -> (i32, i32) {
    %c0_i32 = arith.constant 0 : i32
    return %arg0, %arg1 : i32, i32
  }
}

</mosaic_0001>

<bundles_post_ra>
// kernel: tpu_custom_call.1
= control target key start
LH: loop header
LB: loop body
LE: loop exit
PB: predicated region body
PF: predicated region fallthrough
CT: control target
= control target key end

     0   :  { %8 = vsyncpa [#allocation4], 0  ;;  %s299_s0 = inlined_call_operand.hbm [shape: bf16[16,128], index: 0, kind: input, shape index: {}]   ;;  %s300_s1 = inlined_call_operand.hbm [shape: s8[128,128], index: 1, kind: input, shape index: {}]   ;;  %s301_s2 = inlined_call_operand.vmem [shape: bf16[1,128], index: 2, kind: input, shape index: {}]   ;;  %s302_s3 = inlined_call_operand.hbm [shape: bf16[16,128], index: 3, kind: output, shape index: {}]  }
   0x1   :  { %9 = vsyncpa [#allocation7], 0 }
   0x2   :  { %10 = vsyncpa [#allocation5], 0  ;;  %s15_s14 = sshll.u32 %s299_s0, 4  ;;  %s254_s15 = smov [#allocation3]   ;;  %s16_s14 = int_to_ptr.hbm [resolvable:$true] %s15_s14 }
   0x3   :  { %s17_s16 = sshll.u32 %s254_s15, 4  ;;  %s28_s19 = sshll.u32 %s300_s1, 4  ;;  %s18_s16 = int_to_ptr.vmem [resolvable:$true] %s17_s16  ;;  %s29_s19 = int_to_ptr.hbm [resolvable:$true] %s28_s19 }
   0x4   :  { %s255_s20 = smov 64   ;;  %s256_s21 = smov 4  }
   0x5   :  { %23 = dma.hbm_to_vmem [thread:$0]  %s16_s14, 128, %s18_s16, [#allocation4], %s255_s20, %s255_s20, %s256_s21  }
   0x6   :  { %s257_s22 = smov [#allocation6]   ;;  %s258_s24 = smov 128  }
   0x7   :  { %s30_s23 = sshll.u32 %s257_s22, 4  ;;  %s259_s0 = smov 8   ;;  %s31_s23 = int_to_ptr.vmem [resolvable:$true] %s30_s23 }
   0x8   :  { %36 = dma.hbm_to_vmem [thread:$0]  %s29_s19, 512, %s31_s23, [#allocation7], %s258_s24, %s258_s24, %s259_s0  }
   0x9   :  { %248 = dma.done.wait [#allocation4], 128  }
   0xa   :  { %249 = vsyncadd [#allocation4], 4294967168 }
   0xb   :  { %250 = dma.done.wait [#allocation7], 512  }
   0xc   :  { %251 = vsyncadd [#allocation7], 4294966784  ;;  %v56_v0 = vld [vmem:[#allocation6 + $0x18] sm:$0xff]  ;;  %v55_v1 = vld [vmem:[#allocation6 + $0x10] sm:$0xff]  ;;  %s260_s26 = smov [#allocation8]   ;;  %s145_s30 = sshll.u32 %s302_s3, 4  ;;  %s146_s30 = int_to_ptr.hbm [resolvable:$true] %s145_s30 }
   0xd   :  { %v71_v2 = vunpack.c.2.s8 %v56_v0  ;;  %v72_v3 = vunpack.c.3.s8 %v56_v0  ;;  %v69_v4 = vunpack.c.0.s8 %v56_v0  ;;  %v70_v5 = vunpack.c.1.s8 %v56_v0  ;;  %v54_v18 = vld [vmem:[#allocation6 + $0x8] sm:$0xff]  ;;  %v53_v29 = vld [vmem:[#allocation6] sm:$0xff]  ;;  %v163_v44 = vld [vmem:[#allocation3] sm:$0xff]  ;;  %s143_s27 = sshll.u32 %s260_s26, 4  ;;  %s144_s27 = int_to_ptr.vmem [resolvable:$true] %s143_s27 }
   0xe   :  { %v67_v6 = vunpack.c.2.s8 %v55_v1  ;;  %v68_v7 = vunpack.c.3.s8 %v55_v1  ;;  %v65_v13 = vunpack.c.0.s8 %v55_v1  ;;  %v66_v14 = vunpack.c.1.s8 %v55_v1  ;;  %v128_v45 = vld [vmem:[%s301_s2] sm:$0x1] }
   0xf   :  { %v87_v8 = vcvt.s32.f32 %v71_v2  ;;  %v88_v9 = vcvt.s32.f32 %v72_v3  ;;  %v85_v10 = vcvt.s32.f32 %v69_v4  ;;  %v86_v11 = vcvt.s32.f32 %v70_v5 }
  0x10   :  { %v83_v16 = vcvt.s32.f32 %v67_v6  ;;  %v84_v17 = vcvt.s32.f32 %v68_v7  ;;  %v81_v19 = vcvt.s32.f32 %v65_v13  ;;  %v82_v20 = vcvt.s32.f32 %v66_v14 }
  0x11   :  { %v96_v12 = vpack.c.bf16 %v88_v9, %v87_v8  ;;  %v95_v15 = vpack.c.bf16 %v86_v11, %v85_v10  ;;  %v63_v22 = vunpack.c.2.s8 %v54_v18  ;;  %v64_v23 = vunpack.c.3.s8 %v54_v18 }
  0x12   :  { %v94_v21 = vpack.c.bf16 %v84_v17, %v83_v16  ;;  %v93_v24 = vpack.c.bf16 %v82_v20, %v81_v19  ;;  %v61_v27 = vunpack.c.0.s8 %v54_v18  ;;  %v62_v28 = vunpack.c.1.s8 %v54_v18 }
  0x13   :  { %107 = vmatpush.bf16.msra.mxu0 %v96_v12  ;;  %v79_v25 = vcvt.s32.f32 %v63_v22  ;;  %v80_v26 = vcvt.s32.f32 %v64_v23  ;;  %v59_v30 = vunpack.c.2.s8 %v53_v29  ;;  %v60_v34 = vunpack.c.3.s8 %v53_v29 }
  0x14   :  { %v77_v32 = vcvt.s32.f32 %v61_v27  ;;  %v78_v33 = vcvt.s32.f32 %v62_v28  ;;  %v57_v35 = vunpack.c.0.s8 %v53_v29  ;;  %v58_v39 = vunpack.c.1.s8 %v53_v29 }
  0x15   :  { %v92_v31 = vpack.c.bf16 %v80_v26, %v79_v25  ;;  %v75_v37 = vcvt.s32.f32 %v59_v30  ;;  %v76_v38 = vcvt.s32.f32 %v60_v34  ;;  %v129_v47 = vunpack.c.l.bf16 %v128_v45 }
  0x16   :  { %v91_v36 = vpack.c.bf16 %v78_v33, %v77_v32  ;;  %v73_v41 = vcvt.s32.f32 %v57_v35  ;;  %v74_v42 = vcvt.s32.f32 %v58_v39 }
  0x17   :  { %108 = vmatpush.bf16.msra.mxu0 %v95_v15  ;;  %v90_v40 = vpack.c.bf16 %v76_v38, %v75_v37  ;;  %v132_v48 = vperm.slane %v129_v47, 0 }
  0x18   :  { %v89_v43 = vpack.c.bf16 %v74_v42, %v73_v41 }
  0x1b   :  { %109 = vmatpush.bf16.msra.mxu0 %v94_v21 }
  0x1f   :  { %110 = vmatpush.bf16.msra.mxu0 %v93_v24 }
  0x23   :  { %111 = vmatpush.bf16.msra.mxu0 %v92_v31 }
  0x27   :  { %112 = vmatpush.bf16.msra.mxu0 %v91_v36 }
  0x2b   :  { %113 = vmatpush.bf16.msra.mxu0 %v90_v40 }
  0x2f   :  { %114 = vmatpush.bf16.msra.mxu0 %v89_v43 }
  0x32   :  { %115 = vmatmul.bf16.vlgmr.msra.gmra.mxu0 %v163_v44 }
  0xaf   :  { %v116_v46 = vpop.f32.mrf.mxu0 }
  0xb0   :  { %v133_v50 = vmul.f32 %v132_v48, %v116_v46 }
  0xb7   :  { %v118_v49 = vpop.f32.mrf.mxu0 }
  0xb8   :  { %v134_v51 = vmul.f32 %v132_v48, %v118_v49 }
  0xba   :  { %v167_v52 = vpack.c.bf16 %v134_v51, %v133_v50 }
  0xbc   :  { %168 = vst [vmem:[#allocation8] sm:$0xff] %v167_v52  }
  0xbd   :  { %151 = dma.vmem_to_hbm [thread:$0]  %s144_s27, 128, %s146_s30, [#allocation5], %s255_s20, %s255_s20, %s256_s21  }
  0xbe   :  { %252 = dma.done.wait [#allocation5], 128  }
  0xbf   :  { %253 = vsyncadd [#allocation5], 4294967168 }
  0xc0   :  { %156 = vsyncpa [#allocation4], 1 }
  0xc1   :  { %157 = vsyncpa [#allocation7], 1 }
  0xc2   :  { %158 = vsyncpa [#allocation5], 1 }

</bundles_post_ra>
